<compile_context>
chip_gen: v6e
topology: v6e:2x2x1
jax: 0.10.0
libtpu: 0.0.40
codegen_flags: <defaults>
</compile_context>

<pallas_src>
import jax
import jax.numpy as jnp
import numpy as np
from jax.experimental import pallas as pl
from jax.experimental.pallas import tpu as pltpu

# ---- configuration (module defaults, small shapes) -------------------------
B = 2                 # batch
LEN_TEXT = 16         # N
ALPHABET = 4          # alphabet_size
CHANNELS = 8          # channels
EMBED = 32            # embedding_size
LAYERS = 3            # conv layers
KSIZE = 3             # kernel_size (padding = KSIZE // 2)
N_FINAL = LEN_TEXT // (2 ** LAYERS)   # sequence length after 3 AvgPool1d(2)
ROWS = B * LEN_TEXT
STRIDE = 2 ** LAYERS                  # full-resolution stride of valid rows

assert KSIZE == 3
assert LEN_TEXT % (2 ** LAYERS) == 0
assert LEN_TEXT & (LEN_TEXT - 1) == 0   # power of two (in-kernel pos masks use &)


def _align(n, a):
    return -(-n // a) * a


# ---- static row offsets inside the two parameter bundles -------------------
# weight bundle (bf16, EMBED lanes wide); blocks 16-row aligned (bf16 packing)
_WA = 16
OFF_W0 = 0                                              # (K*ALPHABET, CHANNELS)
_o = _align(OFF_W0 + KSIZE * ALPHABET, _WA)
OFF_WL = []                                             # (K*CHANNELS, CHANNELS) each
for _ in range(1, LAYERS):
    OFF_WL.append(_o)
    _o = _align(_o + KSIZE * CHANNELS, _WA)
OFF_WR1 = _o                                            # (N_FINAL*CHANNELS, EMBED)
_o = _align(OFF_WR1 + N_FINAL * CHANNELS, _WA)
OFF_WR2 = _o                                            # (EMBED, EMBED)
WB_ROWS = _align(OFF_WR2 + EMBED, _WA)

# bias bundle (f32, EMBED lanes wide); blocks 8-row aligned
_BA = 8
OFF_B0 = 0                                              # (ROWS, CHANNELS)
OFF_BL = _align(OFF_B0 + ROWS, _BA)                     # (LAYERS-1, CHANNELS)
OFF_BR1 = _align(OFF_BL + (LAYERS - 1), _BA)            # (1, EMBED)
OFF_BR2 = OFF_BR1 + 1                                   # (1, EMBED)
BB_ROWS = _align(OFF_BR2 + 1, _BA)


def cnn_kernel(x_ref, wb_ref, bb_ref, out_ref):
    f32, bf16 = jnp.float32, jnp.bfloat16

    # position of each row inside its own sequence (LEN_TEXT is a power of 2)
    pos = jax.lax.broadcasted_iota(jnp.int32, (ROWS, 1), 0) & (LEN_TEXT - 1)

    def fused_taps(h, d):
        # tap order matches the fused weight blocks [i-d, i, i+d]; taps that
        # fall on the conv's zero padding are zeroed via the position mask.
        left = jnp.where(pos >= d, pltpu.roll(h, d, 0), 0.0)
        right = jnp.where(pos < LEN_TEXT - d, pltpu.roll(h, ROWS - d, 0), 0.0)
        return jnp.concatenate([left, h, right], axis=1)

    # ---- conv layer 0 (embedding Linear folded into weight/bias), dilation 1
    t = fused_taps(x_ref[...], 1)
    w0 = wb_ref[OFF_W0:OFF_W0 + KSIZE * ALPHABET, 0:CHANNELS]
    y = jnp.dot(t.astype(bf16), w0, preferred_element_type=f32)
    y = jnp.maximum(y + bb_ref[OFF_B0:OFF_B0 + ROWS, 0:CHANNELS], 0.0)
    h = 0.5 * (y + pltpu.roll(y, ROWS - 1, 0))       # AvgPool1d(2) partial sums

    # ---- conv layers 1..L-1 at full resolution, tap dilation 2**l -----------
    for l in range(1, LAYERS):
        d = 2 ** l
        t = fused_taps(h, d)
        w = wb_ref[OFF_WL[l - 1]:OFF_WL[l - 1] + KSIZE * CHANNELS, 0:CHANNELS]
        b = bb_ref[OFF_BL + (l - 1):OFF_BL + l, 0:CHANNELS]
        y = jnp.dot(t.astype(bf16), w, preferred_element_type=f32) + b
        y = jnp.maximum(y, 0.0)
        h = 0.5 * (y + pltpu.roll(y, ROWS - d, 0))   # AvgPool1d(2) partial sums

    # ---- readout layer 1 fused with the "gather valid rows" step (MXU-only) -
    # Each valid row (pos == p*STRIDE) contributes h_row @ wr1_block[p]; rows
    # are masked to their own position block and summed per batch with a
    # (B, ROWS) selection matmul -> no sublane/lane gathers before the MLP.
    hb = h.astype(bf16)
    t_r = None
    for p in range(N_FINAL):
        wp = wb_ref[OFF_WR1 + p * CHANNELS:OFF_WR1 + (p + 1) * CHANNELS, :]
        c = jnp.where(pos == p * STRIDE,
                      jnp.dot(hb, wp, preferred_element_type=f32), 0.0)
        t_r = c if t_r is None else t_r + c

    bidx = jax.lax.broadcasted_iota(jnp.int32, (B, ROWS), 0)
    ridx = jax.lax.broadcasted_iota(jnp.int32, (B, ROWS), 1)
    in_batch = (ridx >= bidx * LEN_TEXT) & (ridx < (bidx + 1) * LEN_TEXT)
    bsel = jnp.where(in_batch, 1.0, 0.0).astype(bf16)          # (B, ROWS)
    z = jnp.dot(bsel, t_r.astype(bf16), preferred_element_type=f32)
    z = jnp.maximum(z + bb_ref[OFF_BR1:OFF_BR1 + 1, :], 0.0)

    # ---- readout layer 2 -----------------------------------------------------
    # TODO(synk): MLP class not shown in the source; assumed Linear->ReLU->Linear
    # with no final activation and dropout=0.
    out = jnp.dot(z.astype(bf16), wb_ref[OFF_WR2:OFF_WR2 + EMBED, :],
                  preferred_element_type=f32)
    out_ref[...] = out + bb_ref[OFF_BR2:OFF_BR2 + 1, :]


def make_params(key):
    ks = jax.random.split(key, 8)
    s = 0.1
    emb_w = s * jax.random.normal(ks[0], (ALPHABET, CHANNELS), jnp.float32)  # x @ W + b
    emb_b = s * jax.random.normal(ks[1], (CHANNELS,), jnp.float32)
    conv_w = s * jax.random.normal(ks[2], (LAYERS, KSIZE, CHANNELS, CHANNELS),
                                   jnp.float32)            # (L, K, C_in, C_out)
    conv_b = s * jax.random.normal(ks[3], (LAYERS, CHANNELS), jnp.float32)
    w1 = s * jax.random.normal(ks[4], (CHANNELS * N_FINAL, EMBED), jnp.float32)
    b1 = s * jax.random.normal(ks[5], (EMBED,), jnp.float32)
    w2 = s * jax.random.normal(ks[6], (EMBED, EMBED), jnp.float32)
    b2 = s * jax.random.normal(ks[7], (EMBED,), jnp.float32)
    return emb_w, emb_b, conv_w, conv_b, w1, b1, w2, b2


def fold_params(params):
    """All weight folds / reshapes / bundling happen here, outside the kernel."""
    emb_w, emb_b, conv_w, conv_b, w1, b1, w2, b2 = [np.asarray(p) for p in params]
    pos = np.arange(ROWS) % LEN_TEXT

    # fold embedding Linear into the fused layer-0 tap weight: (K*A, C)
    w0f = np.concatenate([emb_w @ conv_w[0, k] for k in range(KSIZE)], axis=0)

    # fold the embedding bias into a per-position layer-0 bias: boundary taps
    # read the conv's zero padding, so they must NOT receive the embedding bias
    be_tap = np.stack([emb_b @ conv_w[0, k] for k in range(KSIZE)])      # (K, C)
    left_ok = (pos >= 1).astype(np.float32)[:, None]
    right_ok = (pos < LEN_TEXT - 1).astype(np.float32)[:, None]
    b0 = (conv_b[0][None, :] + be_tap[1][None, :]
          + left_ok * be_tap[0][None, :] + right_ok * be_tap[2][None, :])  # (ROWS, C)

    # readout layer-1 weight per final position: PyTorch flattens (B, C, N_F)
    # as c*N_FINAL + p, so block[p][c, :] = w1[c*N_FINAL + p, :]
    wr1p = w1.reshape(CHANNELS, N_FINAL, EMBED).transpose(1, 0, 2)       # (N_F, C, E)

    # ---- weight bundle (stored bf16: MXU LHS/RHS) ----------------------------
    wb = np.zeros((WB_ROWS, EMBED), np.float32)
    wb[OFF_W0:OFF_W0 + KSIZE * ALPHABET, :CHANNELS] = w0f
    for l in range(1, LAYERS):
        wl = np.concatenate([conv_w[l, k] for k in range(KSIZE)], axis=0)  # (K*C, C)
        wb[OFF_WL[l - 1]:OFF_WL[l - 1] + KSIZE * CHANNELS, :CHANNELS] = wl
    wb[OFF_WR1:OFF_WR1 + N_FINAL * CHANNELS, :] = wr1p.reshape(N_FINAL * CHANNELS, EMBED)
    wb[OFF_WR2:OFF_WR2 + EMBED, :] = w2

    # ---- bias bundle (f32: VPU adds stay full precision) ---------------------
    bb = np.zeros((BB_ROWS, EMBED), np.float32)
    bb[OFF_B0:OFF_B0 + ROWS, :CHANNELS] = b0
    bb[OFF_BL:OFF_BL + (LAYERS - 1), :CHANNELS] = conv_b[1:]
    bb[OFF_BR1, :] = b1
    bb[OFF_BR2, :] = b2

    return jnp.asarray(wb, jnp.bfloat16), jnp.asarray(bb, jnp.float32)


@jax.jit
def cnn_forward(text, wbundle, bbundle):
    x2 = text.reshape(ROWS, ALPHABET)
    vmem = lambda: pl.BlockSpec(memory_space=pltpu.MemorySpace.VMEM)
    return pl.pallas_call(
        cnn_kernel,
        out_shape=jax.ShapeDtypeStruct((B, EMBED), jnp.float32),
        in_specs=[vmem(), vmem(), vmem()],
        out_specs=vmem(),
    )(x2, wbundle, bbundle)


if __name__ == "__main__":
    key = jax.random.PRNGKey(0)
    k_x, k_p = jax.random.split(key)
    # one-hot-ish text input, (B, len_text, alphabet_size)
    text = jax.random.normal(k_x, (B, LEN_TEXT, ALPHABET), jnp.float32)
    params = make_params(k_p)
    wbundle, bbundle = fold_params(params)

    out = cnn_forward(text, wbundle, bbundle)
    jax.block_until_ready(out)
    assert out.shape == (B, EMBED) and out.dtype == jnp.float32
    assert bool(jnp.all(jnp.isfinite(out)))
    print("KERNEL_OK")
</pallas_src>

<mosaic_0001>
module attributes {stable_mosaic.version = 11 : i64} {
  func.func @cnn_kernel(%arg0: memref<32x4xf32, #tpu.memory_space<vmem>>, %arg1: memref<128x32xbf16, #tpu.memory_space<vmem>>, %arg2: memref<48x32xf32, #tpu.memory_space<vmem>>, %arg3: memref<2x32xf32, #tpu.memory_space<vmem>>) attributes {dimension_semantics = [], scalar_prefetch = 0 : i64, scratch_operands = 0 : i64, tpu.core_type = #tpu.core_type<tc>} {
    %0 = tpu.iota {dimensions = array<i32: 0>} : vector<32x1xi32>
    %c15_i32 = arith.constant 15 : i32
    %1 = vector.broadcast %c15_i32 : i32 to vector<32x1xi32>
    %2 = arith.andi %0, %1 : vector<32x1xi32>
    %c0 = arith.constant 0 : index
    %c0_0 = arith.constant 0 : index
    %3 = vector.load %arg0[%c0, %c0_0] : memref<32x4xf32, #tpu.memory_space<vmem>>, vector<32x4xf32>
    %c1_i32 = arith.constant 1 : i32
    %4 = vector.broadcast %c1_i32 : i32 to vector<32x1xi32>
    %5 = arith.cmpi sge, %2, %4 : vector<32x1xi32>
    %c1_i32_1 = arith.constant 1 : i32
    %6 = tpu.dynamic_rotate %3 by %c1_i32_1 dim 0 : vector<32x4xf32>, i32 -> vector<32x4xf32>
    %cst = arith.constant 0.000000e+00 : f32
    %7 = vector.shape_cast %5 : vector<32x1xi1> to vector<32x1xi1>
    %8 = vector.broadcast %7 : vector<32x1xi1> to vector<32x4xi1>
    %9 = vector.broadcast %cst : f32 to vector<32x4xf32>
    %10 = arith.select %8, %6, %9 : vector<32x4xi1>, vector<32x4xf32>
    %c15_i32_2 = arith.constant 15 : i32
    %11 = vector.broadcast %c15_i32_2 : i32 to vector<32x1xi32>
    %12 = arith.cmpi slt, %2, %11 : vector<32x1xi32>
    %c31_i32 = arith.constant 31 : i32
    %13 = tpu.dynamic_rotate %3 by %c31_i32 dim 0 : vector<32x4xf32>, i32 -> vector<32x4xf32>
    %cst_3 = arith.constant 0.000000e+00 : f32
    %14 = vector.shape_cast %12 : vector<32x1xi1> to vector<32x1xi1>
    %15 = vector.broadcast %14 : vector<32x1xi1> to vector<32x4xi1>
    %16 = vector.broadcast %cst_3 : f32 to vector<32x4xf32>
    %17 = arith.select %15, %13, %16 : vector<32x4xi1>, vector<32x4xf32>
    %18 = tpu.concatenate %10, %3, %17 in 1 : vector<32x4xf32>, vector<32x4xf32>, vector<32x4xf32> -> vector<32x12xf32>
    %c0_4 = arith.constant 0 : index
    %c0_5 = arith.constant 0 : index
    %19 = vector.load %arg1[%c0_4, %c0_5] : memref<128x32xbf16, #tpu.memory_space<vmem>>, vector<12x8xbf16>
    %20 = arith.truncf %18 : vector<32x12xf32> to vector<32x12xbf16>
    %cst_6 = arith.constant dense<0.000000e+00> : vector<32x8xf32>
    %21 = tpu.matmul %20, %19, %cst_6 {dimension_numbers = #tpu.dot_dimension_numbers<[1], [0], [0], [1], [0, 0, 1, 1], [], []>} : vector<32x12xbf16>, vector<12x8xbf16>, vector<32x8xf32> -> vector<32x8xf32>
    %c0_7 = arith.constant 0 : index
    %c0_8 = arith.constant 0 : index
    %22 = vector.load %arg2[%c0_7, %c0_8] : memref<48x32xf32, #tpu.memory_space<vmem>>, vector<32x8xf32>
    %23 = arith.addf %21, %22 : vector<32x8xf32>
    %cst_9 = arith.constant 0.000000e+00 : f32
    %24 = vector.broadcast %cst_9 : f32 to vector<32x8xf32>
    %25 = arith.maximumf %23, %24 : vector<32x8xf32>
    %c31_i32_10 = arith.constant 31 : i32
    %26 = tpu.dynamic_rotate %25 by %c31_i32_10 dim 0 : vector<32x8xf32>, i32 -> vector<32x8xf32>
    %27 = arith.addf %25, %26 : vector<32x8xf32>
    %cst_11 = arith.constant 5.000000e-01 : f32
    %28 = vector.broadcast %cst_11 : f32 to vector<32x8xf32>
    %29 = arith.mulf %28, %27 : vector<32x8xf32>
    %c2_i32 = arith.constant 2 : i32
    %30 = vector.broadcast %c2_i32 : i32 to vector<32x1xi32>
    %31 = arith.cmpi sge, %2, %30 : vector<32x1xi32>
    %c2_i32_12 = arith.constant 2 : i32
    %32 = tpu.dynamic_rotate %29 by %c2_i32_12 dim 0 : vector<32x8xf32>, i32 -> vector<32x8xf32>
    %cst_13 = arith.constant 0.000000e+00 : f32
    %33 = vector.shape_cast %31 : vector<32x1xi1> to vector<32x1xi1>
    %34 = vector.broadcast %33 : vector<32x1xi1> to vector<32x8xi1>
    %35 = vector.broadcast %cst_13 : f32 to vector<32x8xf32>
    %36 = arith.select %34, %32, %35 : vector<32x8xi1>, vector<32x8xf32>
    %c14_i32 = arith.constant 14 : i32
    %37 = vector.broadcast %c14_i32 : i32 to vector<32x1xi32>
    %38 = arith.cmpi slt, %2, %37 : vector<32x1xi32>
    %c30_i32 = arith.constant 30 : i32
    %39 = tpu.dynamic_rotate %29 by %c30_i32 dim 0 : vector<32x8xf32>, i32 -> vector<32x8xf32>
    %cst_14 = arith.constant 0.000000e+00 : f32
    %40 = vector.shape_cast %38 : vector<32x1xi1> to vector<32x1xi1>
    %41 = vector.broadcast %40 : vector<32x1xi1> to vector<32x8xi1>
    %42 = vector.broadcast %cst_14 : f32 to vector<32x8xf32>
    %43 = arith.select %41, %39, %42 : vector<32x8xi1>, vector<32x8xf32>
    %44 = tpu.concatenate %36, %29, %43 in 1 : vector<32x8xf32>, vector<32x8xf32>, vector<32x8xf32> -> vector<32x24xf32>
    %c16 = arith.constant 16 : index
    %c0_15 = arith.constant 0 : index
    %45 = vector.load %arg1[%c16, %c0_15] : memref<128x32xbf16, #tpu.memory_space<vmem>>, vector<24x8xbf16>
    %c32 = arith.constant 32 : index
    %c0_16 = arith.constant 0 : index
    %46 = vector.load %arg2[%c32, %c0_16] : memref<48x32xf32, #tpu.memory_space<vmem>>, vector<1x8xf32>
    %47 = arith.truncf %44 : vector<32x24xf32> to vector<32x24xbf16>
    %cst_17 = arith.constant dense<0.000000e+00> : vector<32x8xf32>
    %48 = tpu.matmul %47, %45, %cst_17 {dimension_numbers = #tpu.dot_dimension_numbers<[1], [0], [0], [1], [0, 0, 1, 1], [], []>} : vector<32x24xbf16>, vector<24x8xbf16>, vector<32x8xf32> -> vector<32x8xf32>
    %49 = vector.broadcast %46 : vector<1x8xf32> to vector<32x8xf32>
    %50 = arith.addf %48, %49 : vector<32x8xf32>
    %cst_18 = arith.constant 0.000000e+00 : f32
    %51 = vector.broadcast %cst_18 : f32 to vector<32x8xf32>
    %52 = arith.maximumf %50, %51 : vector<32x8xf32>
    %c30_i32_19 = arith.constant 30 : i32
    %53 = tpu.dynamic_rotate %52 by %c30_i32_19 dim 0 : vector<32x8xf32>, i32 -> vector<32x8xf32>
    %54 = arith.addf %52, %53 : vector<32x8xf32>
    %cst_20 = arith.constant 5.000000e-01 : f32
    %55 = vector.broadcast %cst_20 : f32 to vector<32x8xf32>
    %56 = arith.mulf %55, %54 : vector<32x8xf32>
    %c4_i32 = arith.constant 4 : i32
    %57 = vector.broadcast %c4_i32 : i32 to vector<32x1xi32>
    %58 = arith.cmpi sge, %2, %57 : vector<32x1xi32>
    %c4_i32_21 = arith.constant 4 : i32
    %59 = tpu.dynamic_rotate %56 by %c4_i32_21 dim 0 : vector<32x8xf32>, i32 -> vector<32x8xf32>
    %cst_22 = arith.constant 0.000000e+00 : f32
    %60 = vector.shape_cast %58 : vector<32x1xi1> to vector<32x1xi1>
    %61 = vector.broadcast %60 : vector<32x1xi1> to vector<32x8xi1>
    %62 = vector.broadcast %cst_22 : f32 to vector<32x8xf32>
    %63 = arith.select %61, %59, %62 : vector<32x8xi1>, vector<32x8xf32>
    %c12_i32 = arith.constant 12 : i32
    %64 = vector.broadcast %c12_i32 : i32 to vector<32x1xi32>
    %65 = arith.cmpi slt, %2, %64 : vector<32x1xi32>
    %c28_i32 = arith.constant 28 : i32
    %66 = tpu.dynamic_rotate %56 by %c28_i32 dim 0 : vector<32x8xf32>, i32 -> vector<32x8xf32>
    %cst_23 = arith.constant 0.000000e+00 : f32
    %67 = vector.shape_cast %65 : vector<32x1xi1> to vector<32x1xi1>
    %68 = vector.broadcast %67 : vector<32x1xi1> to vector<32x8xi1>
    %69 = vector.broadcast %cst_23 : f32 to vector<32x8xf32>
    %70 = arith.select %68, %66, %69 : vector<32x8xi1>, vector<32x8xf32>
    %71 = tpu.concatenate %63, %56, %70 in 1 : vector<32x8xf32>, vector<32x8xf32>, vector<32x8xf32> -> vector<32x24xf32>
    %c48 = arith.constant 48 : index
    %c0_24 = arith.constant 0 : index
    %72 = vector.load %arg1[%c48, %c0_24] : memref<128x32xbf16, #tpu.memory_space<vmem>>, vector<24x8xbf16>
    %c33 = arith.constant 33 : index
    %c0_25 = arith.constant 0 : index
    %73 = vector.load %arg2[%c33, %c0_25] : memref<48x32xf32, #tpu.memory_space<vmem>>, vector<1x8xf32>
    %74 = arith.truncf %71 : vector<32x24xf32> to vector<32x24xbf16>
    %cst_26 = arith.constant dense<0.000000e+00> : vector<32x8xf32>
    %75 = tpu.matmul %74, %72, %cst_26 {dimension_numbers = #tpu.dot_dimension_numbers<[1], [0], [0], [1], [0, 0, 1, 1], [], []>} : vector<32x24xbf16>, vector<24x8xbf16>, vector<32x8xf32> -> vector<32x8xf32>
    %76 = vector.broadcast %73 : vector<1x8xf32> to vector<32x8xf32>
    %77 = arith.addf %75, %76 : vector<32x8xf32>
    %cst_27 = arith.constant 0.000000e+00 : f32
    %78 = vector.broadcast %cst_27 : f32 to vector<32x8xf32>
    %79 = arith.maximumf %77, %78 : vector<32x8xf32>
    %c28_i32_28 = arith.constant 28 : i32
    %80 = tpu.dynamic_rotate %79 by %c28_i32_28 dim 0 : vector<32x8xf32>, i32 -> vector<32x8xf32>
    %81 = arith.addf %79, %80 : vector<32x8xf32>
    %cst_29 = arith.constant 5.000000e-01 : f32
    %82 = vector.broadcast %cst_29 : f32 to vector<32x8xf32>
    %83 = arith.mulf %82, %81 : vector<32x8xf32>
    %84 = arith.truncf %83 : vector<32x8xf32> to vector<32x8xbf16>
    %c80 = arith.constant 80 : index
    %c0_30 = arith.constant 0 : index
    %85 = vector.load %arg1[%c80, %c0_30] : memref<128x32xbf16, #tpu.memory_space<vmem>>, vector<8x32xbf16>
    %c0_i32 = arith.constant 0 : i32
    %86 = vector.broadcast %c0_i32 : i32 to vector<32x1xi32>
    %87 = arith.cmpi eq, %2, %86 : vector<32x1xi32>
    %cst_31 = arith.constant dense<0.000000e+00> : vector<32x32xf32>
    %88 = tpu.matmul %84, %85, %cst_31 {dimension_numbers = #tpu.dot_dimension_numbers<[1], [0], [0], [1], [0, 0, 1, 1], [], []>} : vector<32x8xbf16>, vector<8x32xbf16>, vector<32x32xf32> -> vector<32x32xf32>
    %cst_32 = arith.constant 0.000000e+00 : f32
    %89 = vector.shape_cast %87 : vector<32x1xi1> to vector<32x1xi1>
    %90 = vector.broadcast %89 : vector<32x1xi1> to vector<32x32xi1>
    %91 = vector.broadcast %cst_32 : f32 to vector<32x32xf32>
    %92 = arith.select %90, %88, %91 : vector<32x32xi1>, vector<32x32xf32>
    %c88 = arith.constant 88 : index
    %c0_33 = arith.constant 0 : index
    %93 = vector.load %arg1[%c88, %c0_33] : memref<128x32xbf16, #tpu.memory_space<vmem>>, vector<8x32xbf16>
    %c8_i32 = arith.constant 8 : i32
    %94 = vector.broadcast %c8_i32 : i32 to vector<32x1xi32>
    %95 = arith.cmpi eq, %2, %94 : vector<32x1xi32>
    %cst_34 = arith.constant dense<0.000000e+00> : vector<32x32xf32>
    %96 = tpu.matmul %84, %93, %cst_34 {dimension_numbers = #tpu.dot_dimension_numbers<[1], [0], [0], [1], [0, 0, 1, 1], [], []>} : vector<32x8xbf16>, vector<8x32xbf16>, vector<32x32xf32> -> vector<32x32xf32>
    %cst_35 = arith.constant 0.000000e+00 : f32
    %97 = vector.shape_cast %95 : vector<32x1xi1> to vector<32x1xi1>
    %98 = vector.broadcast %97 : vector<32x1xi1> to vector<32x32xi1>
    %99 = vector.broadcast %cst_35 : f32 to vector<32x32xf32>
    %100 = arith.select %98, %96, %99 : vector<32x32xi1>, vector<32x32xf32>
    %101 = arith.addf %92, %100 : vector<32x32xf32>
    %102 = tpu.iota {dimensions = array<i32: 0>} : vector<2x32xi32>
    %103 = tpu.iota {dimensions = array<i32: 1>} : vector<2x32xi32>
    %c16_i32 = arith.constant 16 : i32
    %104 = vector.broadcast %c16_i32 : i32 to vector<2x32xi32>
    %105 = arith.muli %102, %104 : vector<2x32xi32>
    %106 = arith.cmpi sge, %103, %105 : vector<2x32xi32>
    %c1_i32_36 = arith.constant 1 : i32
    %107 = vector.broadcast %c1_i32_36 : i32 to vector<2x32xi32>
    %108 = arith.addi %102, %107 : vector<2x32xi32>
    %c16_i32_37 = arith.constant 16 : i32
    %109 = vector.broadcast %c16_i32_37 : i32 to vector<2x32xi32>
    %110 = arith.muli %108, %109 : vector<2x32xi32>
    %111 = arith.cmpi slt, %103, %110 : vector<2x32xi32>
    %112 = arith.andi %106, %111 : vector<2x32xi1>
    %cst_38 = arith.constant 1.000000e+00 : f32
    %cst_39 = arith.constant 0.000000e+00 : f32
    %113 = vector.broadcast %cst_38 : f32 to vector<2x32xf32>
    %114 = vector.broadcast %cst_39 : f32 to vector<2x32xf32>
    %115 = arith.select %112, %113, %114 : vector<2x32xi1>, vector<2x32xf32>
    %116 = arith.truncf %115 : vector<2x32xf32> to vector<2x32xbf16>
    %117 = arith.truncf %101 : vector<32x32xf32> to vector<32x32xbf16>
    %cst_40 = arith.constant dense<0.000000e+00> : vector<2x32xf32>
    %118 = tpu.matmul %116, %117, %cst_40 {dimension_numbers = #tpu.dot_dimension_numbers<[1], [0], [0], [1], [0, 0, 1, 1], [], []>} : vector<2x32xbf16>, vector<32x32xbf16>, vector<2x32xf32> -> vector<2x32xf32>
    %c40 = arith.constant 40 : index
    %c0_41 = arith.constant 0 : index
    %119 = vector.load %arg2[%c40, %c0_41] : memref<48x32xf32, #tpu.memory_space<vmem>>, vector<1x32xf32>
    %120 = vector.broadcast %119 : vector<1x32xf32> to vector<2x32xf32>
    %121 = arith.addf %118, %120 : vector<2x32xf32>
    %cst_42 = arith.constant 0.000000e+00 : f32
    %122 = vector.broadcast %cst_42 : f32 to vector<2x32xf32>
    %123 = arith.maximumf %121, %122 : vector<2x32xf32>
    %124 = arith.truncf %123 : vector<2x32xf32> to vector<2x32xbf16>
    %c96 = arith.constant 96 : index
    %c0_43 = arith.constant 0 : index
    %125 = vector.load %arg1[%c96, %c0_43] : memref<128x32xbf16, #tpu.memory_space<vmem>>, vector<32x32xbf16>
    %cst_44 = arith.constant dense<0.000000e+00> : vector<2x32xf32>
    %126 = tpu.matmul %124, %125, %cst_44 {dimension_numbers = #tpu.dot_dimension_numbers<[1], [0], [0], [1], [0, 0, 1, 1], [], []>} : vector<2x32xbf16>, vector<32x32xbf16>, vector<2x32xf32> -> vector<2x32xf32>
    %c41 = arith.constant 41 : index
    %c0_45 = arith.constant 0 : index
    %127 = vector.load %arg2[%c41, %c0_45] : memref<48x32xf32, #tpu.memory_space<vmem>>, vector<1x32xf32>
    %128 = vector.broadcast %127 : vector<1x32xf32> to vector<2x32xf32>
    %129 = arith.addf %126, %128 : vector<2x32xf32>
    %c0_46 = arith.constant 0 : index
    %c0_47 = arith.constant 0 : index
    %130 = vector.load %arg3[%c0_46, %c0_47] : memref<2x32xf32, #tpu.memory_space<vmem>>, vector<2x32xf32>
    tpu.vector_store %arg3[%c0_46, %c0_47], %129 {strides = array<i32>} : memref<2x32xf32, #tpu.memory_space<vmem>>, vector<2x32xf32>,
    return
  }
}

</mosaic_0001>

<bundles_post_ra>
// kernel: cnn_forward.1
= control target key start
LH: loop header
LB: loop body
LE: loop exit
PB: predicated region body
PF: predicated region fallthrough
CT: control target
= control target key end

     0   :  { %v16_v2 = vlaneseq  ;;  %s1077_s20 = smov 4   ;;  %vm141_vm2 = vcmask 1045504   ;;  %s1314_s0 = inlined_call_operand.vmem [shape: f32[32,4], index: 0, kind: input, shape index: {}]   ;;  %s1315_s1 = inlined_call_operand.vmem [shape: bf16[128,32], index: 1, kind: input, shape index: {}]   ;;  %s1316_s2 = inlined_call_operand.vmem [shape: f32[48,32], index: 2, kind: input, shape index: {}]   ;;  %s1317_s3 = inlined_call_operand.hbm [shape: f32[2,32], index: 3, kind: output, shape index: {}]  }
   0x1   :  { %v25_v0 = vld [vmem:[%s1314_s0] sm:$0xff]  ;;  %v26_v1 = vld [vmem:[%s1314_s0 + $0x8] sm:$0xff]  ;;  %v27_v3 = vld [vmem:[%s1314_s0 + $0x10] sm:$0xff] }
   0x2   :  { %v59_v4 = vrot.slane %v26_v1, 1  ;;  %v988_v5 = vpack.i.bf16 %v26_v1, %v25_v0  ;;  %v28_v6 = vld [vmem:[%s1314_s0 + $0x18] sm:$0xff]  ;;  %v34_v7 = vrot.slane %v26_v1, 7  ;;  %v33_v8 = vrot.slane %v25_v0, 7  ;;  %v1048_v15 = vld [vmem:[%s1315_s1] sm:$0x3f]  }
   0x3   :  { %v1116_v9 = vshrl.u32 %v16_v2, 7  ;;  %v60_v10 = vrot.slane %v27_v3, 1  ;;  %v58_v11 = vrot.slane %v25_v0, 1  ;;  %v35_v12 = vrot.slane %v27_v3, 7  ;;  %977 = vmatprep.subr.msk.bf16.mxu0 %vm141_vm2, %v1048_v15 }
   0x4   :  { %989 = vrot.lane.b32.xlu0 %v988_v5, %s1077_s20  ;;  %v61_v13 = vrot.slane %v28_v6, 1  ;;  %v993_v14 = vpack.i.bf16 %v28_v6, %v27_v3  ;;  %v36_v17 = vrot.slane %v28_v6, 7 }
   0x5   :  { %v18_v16 = vadd.s32 8, %v1116_v9  ;;  %vm62_vm0 = vcmp.lt.s32.totalorder %v1116_v9, 7  ;;  %v20_v18 = vadd.s32 24, %v1116_v9  ;;  %vm37_vm1 = vcmp.lt.s32.totalorder %v1116_v9, 1 }
   0x6   :  { %v64_v19 = vsel %vm62_vm0, %v59_v4, %v60_v10  ;;  %v66_v22 = vsel %vm62_vm0, %v61_v13, %v58_v11  ;;  %v65_v23 = vsel %vm62_vm0, %v58_v11, %v59_v4  ;;  %v38_v24 = vsel %vm37_vm1, %v35_v12, %v36_v17 }
   0x7   :  { %v1126_v20 = vand.u32 15, %v18_v16  ;;  %v1128_v21 = vand.u32 15, %v20_v18  ;;  %v39_v25 = vsel %vm37_vm1, %v34_v7, %v35_v12  ;;  %v40_v26 = vsel %vm37_vm1, %v33_v8, %v34_v7 }
   0x8   :  { %994 = vrot.lane.b32.xlu0 %v993_v14, %s1077_s20  ;;  %v63_v28 = vsel %vm62_vm0, %v60_v10, %v61_v13  ;;  %v41_v31 = vsel %vm37_vm1, %v36_v17, %v33_v8 }
   0x9   :  { %vm55_vm3 = vcmp.lt.s32.totalorder %v1126_v20, 15  ;;  %vm57_vm4 = vcmp.lt.s32.totalorder %v1128_v21, 15 }
   0xa   :  { %v76_v27 = vsel %vm55_vm3, %v64_v19, 0.0  ;;  %v78_v29 = vsel %vm57_vm4, %v66_v22, 0.0 }
   0xb   :  { %v998_v30 = vpack.i.bf16 %v76_v27, %v65_v23 }
   0xc   :  { %8 = vsyncpa [#allocation3], 0  ;;  %v143_v32 = vsel %vm141_vm2, %v1048_v15, 0  ;;  %s1078_s0 = smov 8   ;;  %v1003_v33 = vpack.i.bf16 %v78_v29, %v63_v28  ;;  %v19_v34 = vadd.s32 16, %v1116_v9  ;;  %v1143_v35 = vand.u32 15, %v1116_v9 }
   0xd   :  { %999 = vrot.lane.b32.xlu1 %v998_v30, %s1078_s0  ;;  %928 = vmatpush3.bf16.msra.mxu0 %v143_v32  ;;  %vm111_vm6 = vcmask 31744   ;;  %vm116_vm8 = vcmask 64512   ;;  %vm134_vm9 = vcmask 97280   ;;  %v127_v61 = vld [vmem:[%s1316_s2 + $0x10] sm:$0xff]  ;;  %v125_v63 = vld [vmem:[%s1316_s2] sm:$0xff]  ;;  %v128_v3 = vld [vmem:[%s1316_s2 + $0x18] sm:$0xff] }
   0xe   :  { %v1145_v37 = vand.u32 15, %v19_v34  ;;  %vm29_vm5 = vcmp.ge.s32.totalorder %v1143_v35, 1  ;;  %v126_v6 = vld [vmem:[%s1316_s2 + $0x8] sm:$0xff]  ;;  %v1049_v14 = vld [vmem:[%s1315_s1 + $0x10] ss:$0 sps:$4 sm:$0xff]   ;;  %vm331_vm10 = vcmask 1043456  }
   0xf   :  { %v50_v41 = vsel %vm29_vm5, %v41_v31, 0.0  ;;  %978 = vmatprep.subr.msk.bf16.mxu1 %vm331_vm10, %v1049_v14  ;;  %v333_v19 = vsel %vm331_vm10, %v1049_v14, 0  ;;  %v1050_v27 = vld [vmem:[%s1315_s1 + $0x8] sm:$0xff]   ;;  %vm222_vm11 = vcmp.lt.s32.totalorder %v1116_v9, 2  ;;  %vm247_vm12 = vcmp.lt.s32.totalorder %v1116_v9, 6  ;;  %s1079_s8 = smov 16  }
  0x10   :  { %vm31_vm7 = vcmp.ge.s32.totalorder %v1145_v37, 1  ;;  %934 = vmatpush3.bf16.msra.mxu1 %v333_v19  ;;  %vm240_vm13 = vcmp.lt.s32.totalorder %v1126_v20, 14  ;;  %vm242_vm14 = vcmp.lt.s32.totalorder %v1128_v21, 14  ;;  %vm216_vm15 = vcmp.ge.s32.totalorder %v1145_v37, 2  ;;  %s1082_s28 = smov [#allocation2]  }
  0x11   :  { %1004 = vrot.lane.b32.xlu1 %v1003_v33, %s1078_s0  ;;  %v52_v49 = vsel %vm31_vm7, %v39_v25, 0.0  ;;  %935 = vmatprep.subr.bf16.mxu1 %v1050_v27  ;;  %vm300_vm1 = vcmask 130048   ;;  %vm324_vm2 = vcmask 195584   ;;  %vm430_vm3 = vcmp.lt.s32.totalorder %v1126_v20, 12  ;;  %s867_s29 = sshll.u32 %s1082_s28, 4  ;;  %s868_s29 = int_to_ptr.vmem [resolvable:$true] %s867_s29 }
  0x12   :  { %vm412_vm4 = vcmp.lt.s32.totalorder %v1116_v9, 4  ;;  %vm432_vm5 = vcmp.lt.s32.totalorder %v1128_v21, 12  ;;  %vm406_vm7 = vcmp.ge.s32.totalorder %v1145_v37, 4  ;;  %p1060_p1 = scmp.lt.s32.totalorder %s868_s29, %s868_s29 }
  0x14   :  { %936 = vmatpush3.bf16.msra.mxu1 %v1050_v27 }
  0x76   :  { %v990_v36 = vpop.permute.xlu0 %989 }
  0x77   :  { %v992_v38 = vunpack.i.h.bf16 %v990_v36  ;;  %v991_v39 = vunpack.i.l.bf16 %v990_v36 }
  0x79   :  { %v112_v45 = vsel %vm111_vm6, %v50_v41, %v991_v39  ;;  %v113_v46 = vsel %vm111_vm6, %v40_v26, %v992_v38 }
  0x7a   :  { %v995_v40 = vpop.permute.xlu0 %994 }
  0x7b   :  { %v997_v43 = vunpack.i.h.bf16 %v995_v40  ;;  %v996_v44 = vunpack.i.l.bf16 %v995_v40 }
  0x7d   :  { %v114_v52 = vsel %vm111_vm6, %v52_v49, %v996_v44  ;;  %v115_v53 = vsel %vm111_vm6, %v38_v24, %v997_v43  ;;  %vm404_vm6 = vcmp.ge.s32.totalorder %v1143_v35, 4 }
  0x7f   :  { %v1000_v42 = vpop.permute.xlu1 %999 }
  0x80   :  { %v1002_v47 = vunpack.i.h.bf16 %v1000_v42  ;;  %v1001_v48 = vunpack.i.l.bf16 %v1000_v42 }
  0x82   :  { %v117_v50 = vsel %vm116_vm8, %v112_v45, %v1001_v48  ;;  %v118_v51 = vsel %vm116_vm8, %v113_v46, %v1002_v47 }
  0x83   :  { %v1005_v54 = vpop.permute.xlu1 %1004  ;;  %v123_v55 = vpack.c.bf16 %v118_v51, %v117_v50 }
  0x84   :  { %v1007_v56 = vunpack.i.h.bf16 %v1005_v54  ;;  %v1006_v57 = vunpack.i.l.bf16 %v1005_v54 }
  0x85   :  { %929 = vmatprep.mubr.msk.bf16.mxu0 %vm134_vm9, %v123_v55 }
  0x86   :  { %v120_v58 = vsel %vm116_vm8, %v115_v53, %v1007_v56  ;;  %v119_v59 = vsel %vm116_vm8, %v114_v52, %v1006_v57 }
  0x87   :  { %v124_v60 = vpack.c.bf16 %v120_v58, %v119_v59 }
  0x89   :  { %930 = vmatmul.mubr.msk.bf16.vlgmr.msra.gmra.mxu0 %vm134_vm9, %v124_v60  ;;  %vm1081_vm9 = vmmov 0  }
 0x149   :  { %v931_v62 = vpop.f32.mrf.mxu0 }
 0x14a   :  { %v188_v0 = vadd.f32 %v931_v62, %v127_v61 }
 0x14b   :  { %v179_v1 = vpop.f32.mrf.mxu0 }
 0x14c   :  { %v180_v4 = vadd.f32 %v179_v1, %v125_v63  ;;  %v196_v7 = vmax.f32 %v188_v0, 0.0 }
 0x14d   :  { %v932_v5 = vpop.f32.mrf.mxu0 }
 0x14e   :  { %v194_v8 = vmax.f32 %v180_v4, 0.0  ;;  %v191_v10 = vadd.f32 %v932_v5, %v128_v3  ;;  %v200_v15 = vrot.slane %v196_v7, 1 }
 0x14f   :  { %v182_v11 = vpop.f32.mrf.mxu0 }
 0x150   :  { %v197_v12 = vmax.f32 %v191_v10, 0.0  ;;  %v183_v13 = vadd.f32 %v182_v11, %v126_v6  ;;  %v198_v16 = vrot.slane %v194_v8, 1 }
 0x152   :  { %v201_v17 = vrot.slane %v197_v12, 1  ;;  %v195_v18 = vmax.f32 %v183_v13, 0.0 }
 0x154   :  { %v202_v22 = vsel %vm62_vm0, %v200_v15, %v201_v17  ;;  %v205_v23 = vsel %vm62_vm0, %v201_v17, %v198_v16  ;;  %v199_v24 = vrot.slane %v195_v18, 1 }
 0x155   :  { %v208_v25 = vadd.f32 %v202_v22, %v196_v7  ;;  %v209_v26 = vadd.f32 %v205_v23, %v197_v12 }
 0x156   :  { %v203_v28 = vsel %vm62_vm0, %v199_v24, %v200_v15  ;;  %v204_v29 = vsel %vm62_vm0, %v198_v16, %v199_v24  ;;  %vm214_vm0 = vcmp.ge.s32.totalorder %v1143_v35, 2  ;;  %v878_v24 = vld [vmem:[%s1316_s2 + $0x20] ss:$0 sm:$0xff] }
 0x157   :  { %v213_v30 = vmul.f32 0.5, %v209_v26  ;;  %v206_v31 = vadd.f32 %v204_v29, %v194_v8  ;;  %v207_v32 = vadd.f32 %v203_v28, %v195_v18  ;;  %v212_v33 = vmul.f32 0.5, %v208_v25 }
 0x159   :  { %v221_v34 = vrot.slane %v213_v30, 6  ;;  %v211_v36 = vmul.f32 0.5, %v207_v32  ;;  %v1008_v38 = vpack.i.bf16 %v213_v30, %v212_v33  ;;  %v246_v39 = vrot.slane %v213_v30, 2 }
 0x15a   :  { %v210_v40 = vmul.f32 0.5, %v206_v31  ;;  %v245_v41 = vrot.slane %v212_v33, 2  ;;  %v220_v42 = vrot.slane %v212_v33, 6 }
 0x15b   :  { %v219_v43 = vrot.slane %v211_v36, 6  ;;  %v244_v44 = vrot.slane %v211_v36, 2  ;;  %1009 = vrot.lane.b32.xlu1 %v1008_v38, %s1078_s0  ;;  %v1051_v38 = vld [vmem:[%s1315_s1 + $0x20] ss:$0 sps:$4 sm:$0xff]  }
 0x15c   :  { %v1013_v45 = vpack.i.bf16 %v211_v36, %v210_v40  ;;  %v243_v46 = vrot.slane %v210_v40, 2  ;;  %v223_v47 = vsel %vm222_vm11, %v220_v42, %v221_v34  ;;  %v218_v50 = vrot.slane %v210_v40, 6  ;;  %979 = vmatprep.subr.msk.bf16.mxu0 %vm331_vm10, %v1051_v38 }
 0x15d   :  { %v249_v48 = vsel %vm247_vm12, %v244_v44, %v245_v41  ;;  %v224_v49 = vsel %vm222_vm11, %v219_v43, %v220_v42  ;;  %v248_v51 = vsel %vm247_vm12, %v245_v41, %v246_v39 }
 0x15e   :  { %1014 = vrot.lane.b32.xlu0 %v1013_v45, %s1078_s0  ;;  %v251_v52 = vsel %vm247_vm12, %v246_v39, %v243_v46  ;;  %v250_v53 = vsel %vm247_vm12, %v243_v46, %v244_v44  ;;  %v261_v54 = vsel %vm240_vm13, %v249_v48, 0.0  ;;  %v225_v57 = vsel %vm222_vm11, %v218_v50, %v219_v43 }
 0x15f   :  { %v263_v55 = vsel %vm242_vm14, %v251_v52, 0.0  ;;  %v1018_v56 = vpack.i.bf16 %v261_v54, %v250_v53  ;;  %v226_v58 = vsel %vm222_vm11, %v221_v34, %v218_v50  ;;  %v237_v3 = vsel %vm216_vm15, %v224_v49, 0.0  ;;  %v1052_v49 = vld [vmem:[%s1315_s1 + $0x18] sm:$0xff]  }
 0x160   :  { %v1023_v59 = vpack.i.bf16 %v263_v55, %v248_v51  ;;  %v235_v6 = vsel %vm214_vm0, %v226_v58, 0.0  ;;  %v511_v43 = vsel %vm331_vm10, %v1051_v38, 0  ;;  %v659_v38 = vld [vmem:[%s1315_s1 + $0x2c] sm:$0xf]  ;;  %vm663_vm11 = vcmp.eq.s32.totalorder %v1128_v21, 8 }
 0x161   :  { %942 = vmatpush3.bf16.msra.mxu0 %v511_v43  ;;  %vm585_vm15 = vcmp.eq.s32.totalorder %v1143_v35, 0  ;;  %vm661_vm0 = vcmp.eq.s32.totalorder %v1126_v20, 8  ;;  %v1054_v20 = vld [vmem:[%s1315_s1 + $0x30] sm:$0xff]   ;;  %v892_v35 = vld [vmem:[%s1316_s2 + $0x28] ss:$0 sm:$0xff] }
 0x162   :  { %1024 = vrot.lane.b32.xlu1 %v1023_v59, %s1079_s8  ;;  %1019 = vrot.lane.b32.xlu0 %v1018_v56, %s1079_s8 }
 0x163   :  { %943 = vmatprep.subr.bf16.mxu0 %v1052_v49 }
 0x165   :  { %944 = vmatpush3.bf16.msra.mxu0 %v1052_v49 }
 0x166   :  { %981 = vmatprep.subr.msk.bf16.mxu0 %vm331_vm10, %v659_v38 }
 0x1cd   :  { %v1010_v60 = vpop.permute.xlu1 %1009 }
 0x1ce   :  { %v1012_v62 = vunpack.i.h.bf16 %v1010_v60  ;;  %v1011_v63 = vunpack.i.l.bf16 %v1010_v60 }
 0x1d0   :  { %v1015_v61 = vpop.permute.xlu0 %1014  ;;  %v298_v12 = vsel %vm116_vm8, %v237_v3, %v1011_v63  ;;  %v299_v13 = vsel %vm116_vm8, %v223_v47, %v1012_v62 }
 0x1d1   :  { %v1017_v0 = vunpack.i.h.bf16 %v1015_v61  ;;  %v1016_v1 = vunpack.i.l.bf16 %v1015_v61 }
 0x1d3   :  { %v296_v14 = vsel %vm116_vm8, %v235_v6, %v1016_v1  ;;  %v297_v15 = vsel %vm116_vm8, %v225_v57, %v1017_v0 }
 0x1d4   :  { %v1025_v4 = vpop.permute.xlu1 %1024  ;;  %v1020_v5 = vpop.permute.xlu0 %1019 }
 0x1d5   :  { %v1027_v7 = vunpack.i.h.bf16 %v1025_v4  ;;  %v1026_v8 = vunpack.i.l.bf16 %v1025_v4  ;;  %v1022_v10 = vunpack.i.h.bf16 %v1020_v5  ;;  %v1021_v11 = vunpack.i.l.bf16 %v1020_v5 }
 0x1d7   :  { %v304_v16 = vsel %vm300_vm1, %v299_v13, %v1027_v7  ;;  %v303_v17 = vsel %vm300_vm1, %v298_v12, %v1026_v8  ;;  %v301_v18 = vsel %vm300_vm1, %v296_v14, %v1021_v11  ;;  %v302_v19 = vsel %vm300_vm1, %v297_v15, %v1022_v10 }
 0x1d8   :  { %v310_v22 = vpack.c.bf16 %v304_v16, %v303_v17  ;;  %v309_v23 = vpack.c.bf16 %v302_v19, %v301_v18 }
 0x1da   :  { %937 = vmatprep.mubr.msk.bf16.mxu1 %vm324_vm2, %v309_v23 }
 0x1db   :  { %938 = vmatmul.mubr.msk.bf16.vlgmr.msra.gmra.mxu1 %vm324_vm2, %v310_v22 }
 0x29b   :  { %v939_v25 = vpop.f32.mrf.mxu1 }
 0x29c   :  { %v378_v26 = vadd.f32 %v939_v25, %v878_v24 }
 0x29d   :  { %v369_v27 = vpop.f32.mrf.mxu1 }
 0x29e   :  { %v370_v28 = vadd.f32 %v878_v24, %v369_v27  ;;  %v386_v30 = vmax.f32 %v378_v26, 0.0 }
 0x29f   :  { %v940_v29 = vpop.f32.mrf.mxu1 }
 0x2a0   :  { %v384_v31 = vmax.f32 %v370_v28, 0.0  ;;  %v381_v32 = vadd.f32 %v940_v29, %v878_v24  ;;  %v390_v39 = vrot.slane %v386_v30, 2 }
 0x2a1   :  { %v372_v33 = vpop.f32.mrf.mxu1 }
 0x2a2   :  { %v387_v34 = vmax.f32 %v381_v32, 0.0  ;;  %v373_v36 = vadd.f32 %v878_v24, %v372_v33  ;;  %v388_v40 = vrot.slane %v384_v31, 2 }
 0x2a4   :  { %v391_v41 = vrot.slane %v387_v34, 2  ;;  %v385_v42 = vmax.f32 %v373_v36, 0.0 }
 0x2a6   :  { %v395_v44 = vsel %vm247_vm12, %v391_v41, %v388_v40  ;;  %v389_v45 = vrot.slane %v385_v42, 2  ;;  %v392_v46 = vsel %vm247_vm12, %v390_v39, %v391_v41 }
 0x2a7   :  { %v399_v47 = vadd.f32 %v395_v44, %v387_v34  ;;  %v398_v48 = vadd.f32 %v392_v46, %v386_v30 }
 0x2a8   :  { %v393_v50 = vsel %vm247_vm12, %v389_v45, %v390_v39  ;;  %v394_v51 = vsel %vm247_vm12, %v388_v40, %v389_v45  ;;  %v584_v39 = vld [vmem:[%s1315_s1 + $0x28] sm:$0xf]  ;;  %v665_v40 = vsel %vm331_vm10, %v659_v38, 0 }
 0x2a9   :  { %v403_v52 = vmul.f32 0.5, %v399_v47  ;;  %v397_v53 = vadd.f32 %v393_v50, %v385_v42  ;;  %v402_v54 = vmul.f32 0.5, %v398_v48  ;;  %v396_v55 = vadd.f32 %v394_v51, %v384_v31  ;;  %980 = vmatprep.subr.msk.bf16.mxu1 %vm331_vm10, %v584_v39  ;;  %v883_v42 = vld [vmem:[%s1316_s2 + $0x21] ss:$0 sm:$0xff] }
 0x2aa   :  { %v596_v41 = vsel %vm331_vm10, %v584_v39, 0  ;;  %vm587_vm10 = vcmp.eq.s32.totalorder %v1145_v37, 0 }
 0x2ab   :  { %v401_v56 = vmul.f32 0.5, %v397_v53  ;;  %v1028_v57 = vpack.i.bf16 %v403_v52, %v402_v54  ;;  %v400_v58 = vmul.f32 0.5, %v396_v55  ;;  %v411_v59 = vrot.slane %v403_v52, 4  ;;  %950 = vmatpush3.bf16.msra.mxu1 %v596_v41  ;;  %vm893_vm13 = vmpackc.low %vm663_vm11, %vm587_vm10 }
 0x2ac   :  { %v410_v61 = vrot.slane %v402_v54, 4 }
 0x2ad   :  { %v409_v60 = vrot.slane %v401_v56, 4  ;;  %1029 = vrot.lane.b32.xlu1 %v1028_v57, %s1078_s0  ;;  %v1033_v62 = vpack.i.bf16 %v401_v56, %v400_v58  ;;  %v408_v63 = vrot.slane %v400_v58, 4 }
 0x2ae   :  { %v413_v5 = vsel %vm412_vm4, %v410_v61, %v411_v59 }
 0x2af   :  { %v414_v0 = vsel %vm412_vm4, %v409_v60, %v410_v61  ;;  %1034 = vrot.lane.b32.xlu0 %v1033_v62, %s1078_s0  ;;  %v416_v1 = vsel %vm412_vm4, %v411_v59, %v408_v63  ;;  %v415_v3 = vsel %vm412_vm4, %v408_v63, %v409_v60 }
 0x2b0   :  { %v442_v4 = vsel %vm430_vm3, %v414_v0, 0.0  ;;  %v444_v6 = vsel %vm432_vm5, %v416_v1, 0.0  ;;  %v425_v16 = vsel %vm404_vm6, %v416_v1, 0.0  ;;  %v427_v17 = vsel %vm406_vm7, %v414_v0, 0.0 }
 0x2b1   :  { %v1038_v7 = vpack.i.bf16 %v442_v4, %v415_v3  ;;  %v1043_v8 = vpack.i.bf16 %v444_v6, %v413_v5  ;;  %vm859_vm3 = vcmask 254976  }
 0x2b3   :  { %1044 = vrot.lane.b32.xlu1 %v1043_v8, %s1079_s8  ;;  %1039 = vrot.lane.b32.xlu0 %v1038_v7, %s1079_s8 }
 0x31f   :  { %v1030_v10 = vpop.permute.xlu1 %1029 }
 0x320   :  { %v1032_v12 = vunpack.i.h.bf16 %v1030_v10  ;;  %v1031_v13 = vunpack.i.l.bf16 %v1030_v10 }
 0x321   :  { %v1035_v11 = vpop.permute.xlu0 %1034 }
 0x322   :  { %v1037_v14 = vunpack.i.h.bf16 %v1035_v11  ;;  %v1036_v15 = vunpack.i.l.bf16 %v1035_v11  ;;  %v479_v26 = vsel %vm116_vm8, %v427_v17, %v1031_v13  ;;  %v480_v27 = vsel %vm116_vm8, %v413_v5, %v1032_v12 }
 0x323   :  { %v1080_v11 = vmov 0.0   ;;  %v736_v12 = vadd.s32 1, %v1116_v9  ;;  %v733_v13 = vand.u32 127, %v16_v2 }
 0x324   :  { %v477_v28 = vsel %vm116_vm8, %v425_v16, %v1036_v15  ;;  %v478_v29 = vsel %vm116_vm8, %v415_v3, %v1037_v14  ;;  %961 = vmatprep.subr.bf16.mxu1 %v1080_v11  ;;  %v734_v14 = vmul.u32 16, %v1116_v9 }
 0x325   :  { %v1045_v18 = vpop.permute.xlu1 %1044  ;;  %v1040_v19 = vpop.permute.xlu0 %1039  ;;  %v737_v15 = vmul.u32 16, %v736_v12 }
 0x326   :  { %v1047_v22 = vunpack.i.h.bf16 %v1045_v18  ;;  %v1046_v23 = vunpack.i.l.bf16 %v1045_v18  ;;  %v1042_v24 = vunpack.i.h.bf16 %v1040_v19  ;;  %v1041_v25 = vunpack.i.l.bf16 %v1040_v19 }
 0x327   :  { %vm738_vm12 = vcmp.lt.s32.totalorder %v733_v13, %v737_v15 }
 0x328   :  { %v484_v30 = vsel %vm300_vm1, %v480_v27, %v1047_v22  ;;  %v483_v31 = vsel %vm300_vm1, %v479_v26, %v1046_v23  ;;  %v481_v32 = vsel %vm300_vm1, %v477_v28, %v1041_v25  ;;  %v482_v33 = vsel %vm300_vm1, %v478_v29, %v1042_v24  ;;  %vm896_vm1 = vmpackc.low %vm661_vm0, %vm585_vm15  ;;  %v1053_v26 = vld [vmem:[%s1315_s1 + $0x38] sm:$0xff]   ;;  %s1055_s1 = scalar_lea.vmem %s868_s29, 32 }
 0x329   :  { %v490_v34 = vpack.c.bf16 %v484_v30, %v483_v31  ;;  %v489_v36 = vpack.c.bf16 %v482_v33, %v481_v32  ;;  %p1056_p0 = scmp.ne.s32.totalorder %s868_s29, %s1055_s1  ;;  %p1061_p2 = scmp.lt.s32.totalorder %s1055_s1, %s1055_s1 }
 0x32b   :  { %945 = vmatprep.mubr.msk.bf16.mxu0 %vm324_vm2, %v489_v36  ;;  %p1062_p3 = por %p1061_p2, %p1060_p1 }
 0x32c   :  { %946 = vmatmul.mubr.msk.bf16.vlgmr.msra.gmra.mxu0 %vm324_vm2, %v490_v34  ;;  %vm749_vm2 = vcmask 261120   ;;  %v900_v34 = vld [vmem:[%s1316_s2 + $0x29] ss:$0 sm:$0xff] }
 0x32d   :  { %956 = vmatpush3.bf16.msra.mxu0 %v665_v40  ;;  %p1063_p4 = pnand %p1062_p3, %p1056_p0 }
 0x32e   :  { %969 = vmatprep.subr.bf16.mxu0 %v1080_v11 }
 0x3ec   :  { %v947_v43 = vpop.f32.mrf.mxu0 }
 0x3ed   :  { %v556_v44 = vadd.f32 %v947_v43, %v883_v42 }
 0x3ee   :  { %v547_v45 = vpop.f32.mrf.mxu0 }
 0x3ef   :  { %v548_v46 = vadd.f32 %v883_v42, %v547_v45  ;;  %v564_v48 = vmax.f32 %v556_v44, 0.0 }
 0x3f0   :  { %v948_v47 = vpop.f32.mrf.mxu0 }
 0x3f1   :  { %v562_v49 = vmax.f32 %v548_v46, 0.0  ;;  %v559_v50 = vadd.f32 %v948_v47, %v883_v42  ;;  %v568_v54 = vrot.slane %v564_v48, 4 }
 0x3f2   :  { %v550_v51 = vpop.f32.mrf.mxu0 }
 0x3f3   :  { %v565_v52 = vmax.f32 %v559_v50, 0.0  ;;  %v551_v53 = vadd.f32 %v883_v42, %v550_v51  ;;  %v566_v55 = vrot.slane %v562_v49, 4 }
 0x3f5   :  { %v569_v56 = vrot.slane %v565_v52, 4  ;;  %v563_v57 = vmax.f32 %v551_v53, 0.0 }
 0x3f7   :  { %v570_v58 = vsel %vm412_vm4, %v568_v54, %v569_v56  ;;  %v573_v59 = vsel %vm412_vm4, %v569_v56, %v566_v55  ;;  %v567_v60 = vrot.slane %v563_v57, 4 }
 0x3f8   :  { %v576_v61 = vadd.f32 %v570_v58, %v564_v48  ;;  %v577_v62 = vadd.f32 %v573_v59, %v565_v52 }
 0x3f9   :  { %v571_v63 = vsel %vm412_vm4, %v567_v60, %v568_v54  ;;  %v572_v0 = vsel %vm412_vm4, %v566_v55, %v567_v60 }
 0x3fa   :  { %v574_v1 = vadd.f32 %v572_v0, %v562_v49  ;;  %v575_v3 = vadd.f32 %v571_v63, %v563_v57  ;;  %v580_v4 = vmul.f32 0.5, %v576_v61  ;;  %v581_v5 = vmul.f32 0.5, %v577_v62 }
 0x3fc   :  { %v578_v6 = vmul.f32 0.5, %v574_v1  ;;  %v579_v7 = vmul.f32 0.5, %v575_v3  ;;  %v583_v10 = vpack.c.bf16 %v581_v5, %v580_v4 }
 0x3fe   :  { %v582_v8 = vpack.c.bf16 %v579_v7, %v578_v6 }
 0x400   :  { %951 = vmatprep.mubr.msk.bf16.mxu1 %vm116_vm8, %v582_v8  ;;  %957 = vmatprep.mubr.msk.bf16.mxu0 %vm116_vm8, %v582_v8 }
 0x401   :  { %952 = vmatmul.mubr.msk.bf16.vlgmr.msra.gmra.mxu1 %vm116_vm8, %v583_v10  ;;  %958 = vmatmul.mubr.msk.bf16.vlgmr.msra.gmra.mxu0 %vm116_vm8, %v583_v10  ;;  %vm735_vm8 = vcmp.ge.s32.totalorder %v733_v13, %v734_v14 }
 0x402   :  { %965 = vmatprep.mubr.msk.bf16.mxu1 %vm1081_vm9, %v1080_v11  ;;  %973 = vmatprep.mubr.msk.bf16.mxu0 %vm1081_vm9, %v1080_v11  ;;  %vm739_vm14 = vmand %vm735_vm8, %vm738_vm12 }
 0x403   :  { %v740_v25 = vsel %vm739_vm14, 1.0, %v1080_v11  ;;  %970 = vmatpush3.bf16.msra.mxu0 %v1053_v26 }
 0x404   :  { %v741_v37 = vpack.c.bf16 %v740_v25, %v740_v25  ;;  %971 = vmatprep.subr.bf16.mxu0 %v1080_v11 }
 0x407   :  { %972 = vmatpush3.bf16.msra.mxu0 %v1054_v20 }
 0x4c1   :  { %v953_v16 = vpop.f32.mrf.mxu1  ;;  %v959_v17 = vpop.f32.mrf.mxu0 }
 0x4c3   :  { %v632_v18 = vpop.f32.mrf.mxu1  ;;  %v701_v19 = vpop.f32.mrf.mxu0 }
 0x4c5   :  { %v954_v22 = vpop.f32.mrf.mxu1  ;;  %v960_v23 = vpop.f32.mrf.mxu0 }
 0x4c6   :  { %v894_v24 = vpack.c.bf16 %v960_v23, %v953_v16 }
 0x4c7   :  { %v635_v2 = vpop.f32.mrf.mxu1  ;;  %v704_v9 = vpop.f32.mrf.mxu0 }
 0x4c8   :  { %962 = vmatpush3.bf16.msk.msra.mxu1 %vm893_vm13, %v894_v24  ;;  %v897_v21 = vpack.c.bf16 %v704_v9, %v632_v18 }
 0x4c9   :  { %963 = vmatprep.subr.bf16.mxu1 %v1080_v11 }
 0x4cc   :  { %964 = vmatpush3.bf16.msk.msra.mxu1 %vm896_vm1, %v897_v21 }
 0x4cf   :  { %966 = vmatmul.mubr.msk.bf16.vlgmr.msra.gmra.mxu1 %vm749_vm2, %v741_v37 }
 0x58f   :  { %v787_v27 = vpop.f32.mrf.mxu1 }
 0x590   :  { %v788_v28 = vadd.f32 %v892_v35, %v787_v27 }
 0x591   :  { %v967_v29 = vpop.f32.mrf.mxu1 }
 0x592   :  { %v793_v30 = vmax.f32 %v788_v28, 0.0 }
 0x593   :  { %v790_v31 = vpop.f32.mrf.mxu1 }
 0x594   :  { %v794_v32 = vpack.c.bf16 %v793_v30, %v793_v30 }
 0x595   :  { %v968_v33 = vpop.f32.mrf.mxu1 }
 0x596   :  { %974 = vmatmul.mubr.msk.bf16.vlgmr.msra.gmra.mxu0 %vm749_vm2, %v794_v32 }
 0x656   :  { %v853_v36 = vpop.f32.mrf.mxu0 }
 0x657   :  { %v854_v38 = vadd.f32 %v900_v34, %v853_v36 }
 0x658   :  { %v975_v39 = vpop.f32.mrf.mxu0 }
 0x659   :  { %860 = vst.msk [vmem:[#allocation2] sm:$0x3] %vm859_vm3, %v854_v38 }
 0x65a   :  { %v856_v40 = vpop.f32.mrf.mxu0 }
 0x65b   :  { %1066 = shalt.err (!%p1063_p4)
}
 0x65c   :  { %870 = dma.vmem_to_hbm [thread:$0]  %s868_s29, 32, %s1317_s3, [#allocation3]   ;;  %v976_v41 = vpop.f32.mrf.mxu0 }
 0x65d   :  { %1075 = dma.done.wait [#allocation3], 32  }
 0x65e   :  { %1076 = vsyncadd [#allocation3], 4294967264 }
 0x65f   :  { %874 = vsyncpa [#allocation3], 1 }

</bundles_post_ra>
